<compile_context>
chip_gen: v6e
topology: v6e:2x2x1
jax: 0.10.0
libtpu: 0.0.40
codegen_flags: <defaults>
</compile_context>

<pallas_src>
import functools

import jax
import jax.numpy as jnp
from jax.experimental import pallas as pl
from jax.experimental.pallas import tpu as pltpu

_EPS = 1e-12  # F.normalize default eps


def _norm_linear_kernel(x_ref, w_ref, o_ref):
    """x_ref: (tm, K) f32, w_ref: (K, M) f32 (resident), o_ref: (tm, M) f32."""
    x = x_ref[...]
    # Row-wise L2 normalize x (dim=1): x * rsqrt(max(sum(x*x), eps^2))
    #   == x / max(||x||, eps)  (identical to F.normalize).
    row_ss = jnp.sum(x * x, axis=1, keepdims=True)
    x_n = x * jax.lax.rsqrt(jnp.maximum(row_ss, _EPS * _EPS))

    # Column-wise L2 normalize the weight (dim=0).  Recomputed per grid step:
    # ~2*K*M VPU ops vs tm*K*M MXU MACs (<2% for tm>=64) and stays correct
    # under "parallel" (megacore) grid sharding, unlike a step-0-only scratch.
    w = w_ref[...]
    col_ss = jnp.sum(w * w, axis=0, keepdims=True)
    w_n = w * jax.lax.rsqrt(jnp.maximum(col_ss, _EPS * _EPS))

    o_ref[...] = jnp.dot(
        x_n, w_n, preferred_element_type=jnp.float32).astype(o_ref.dtype)


def _round_up(v, m):
    return (v + m - 1) // m * m


@functools.partial(jax.jit, static_argnames=("block_m",))
def norm_linear_forward(x, weight, *, block_m=128):
    """out = normalize(x, dim=1) @ normalize(weight, dim=0)."""
    n, k = x.shape
    kw, m = weight.shape
    assert k == kw, (x.shape, weight.shape)

    # Batch tile: at least 8 rows (f32 sublanes), at most block_m.
    tm = _round_up(min(block_m, _round_up(n, 8)), 8)
    n_pad = _round_up(n, tm)
    if n_pad != n:
        x = jnp.pad(x, ((0, n_pad - n), (0, 0)))

    out = pl.pallas_call(
        _norm_linear_kernel,
        out_shape=jax.ShapeDtypeStruct((n_pad, m), jnp.float32),
        grid_spec=pltpu.PrefetchScalarGridSpec(
            num_scalar_prefetch=0,
            grid=(n_pad // tm,),
            in_specs=[
                pl.BlockSpec((tm, k), lambda i: (i, 0)),  # x tile (pipelined)
                pl.BlockSpec((k, m), lambda i: (0, 0)),   # weight (resident)
            ],
            out_specs=pl.BlockSpec((tm, m), lambda i: (i, 0)),
        ),
        compiler_params=pltpu.CompilerParams(
            dimension_semantics=("parallel",)),  # batch tiles across v7x cores
    )(x.astype(jnp.float32), weight.astype(jnp.float32))
    return out[:n]


def init_norm_linear_weight(key, in_features, out_features):
    """Mimics NormLinear.__init__: uniform(-1,1), renorm_(2, 1, 1e-5).mul_(1e5)
    i.e. each column clamped to (at most) unit L2 norm."""
    w = jax.random.uniform(key, (in_features, out_features),
                           minval=-1.0, maxval=1.0, dtype=jnp.float32)
    col_norm = jnp.linalg.norm(w, axis=0, keepdims=True)
    scale = jnp.where(col_norm > 1.0, 1.0 / col_norm, 1.0)
    return (w * scale).astype(jnp.float32)


if __name__ == "__main__":
    key = jax.random.PRNGKey(0)
    k_x, k_w = jax.random.split(key)

    # Small, module-consistent shapes: batch=16, in_features=256, out_features=128.
    N, IN, OUT = 16, 256, 128
    x = jax.random.normal(k_x, (N, IN), dtype=jnp.float32)
    weight = init_norm_linear_weight(k_w, IN, OUT)

    # block_m=8 -> grid of 2 batch tiles: exercises the pipelined/"parallel"
    # path with the weight held resident across steps.
    out = norm_linear_forward(x, weight, block_m=8)
    out = jax.block_until_ready(out)

    # Reference: F.normalize(x, dim=1) @ F.normalize(weight, dim=0).
    x_ref = x / jnp.maximum(jnp.linalg.norm(x, axis=1, keepdims=True), _EPS)
    w_ref = weight / jnp.maximum(jnp.linalg.norm(weight, axis=0, keepdims=True), _EPS)
    ref = x_ref @ w_ref

    assert out.shape == (N, OUT), out.shape
    assert jnp.allclose(out, ref, atol=1e-5, rtol=1e-5), \
        float(jnp.max(jnp.abs(out - ref)))

    print("KERNEL_OK")
</pallas_src>

<mosaic_0001>
module attributes {stable_mosaic.version = 11 : i64} {
  func.func @_norm_linear_kernel(%arg0: i32, %arg1: memref<8x256xf32, #tpu.memory_space<vmem>>, %arg2: memref<256x128xf32, #tpu.memory_space<vmem>>, %arg3: memref<8x128xf32, #tpu.memory_space<vmem>>) attributes {dimension_semantics = [#tpu.dimension_semantics<parallel>], iteration_bounds = array<i64: 2>, scalar_prefetch = 0 : i64, scratch_operands = 0 : i64, tpu.core_type = #tpu.core_type<tc>, window_params = [{transform_indices = @transform_0, window_bounds = array<i64: 8, 256>}, {pipeline_mode = #tpu.pipeline_mode<synchronous>, transform_indices = @transform_1, window_bounds = array<i64: 256, 128>}, {transform_indices = @transform_2, window_bounds = array<i64: 8, 128>}]} {
    %c0 = arith.constant 0 : index
    %c0_0 = arith.constant 0 : index
    %0 = vector.load %arg1[%c0, %c0_0] : memref<8x256xf32, #tpu.memory_space<vmem>>, vector<8x256xf32>
    %1 = arith.mulf %0, %0 : vector<8x256xf32>
    %cst = arith.constant dense<0.000000e+00> : vector<8xf32>
    %2 = vector.multi_reduction <add>, %1, %cst [1] : vector<8x256xf32> to vector<8xf32>
    %3 = vector.shape_cast %2 : vector<8xf32> to vector<8x1xf32>
    %cst_1 = arith.constant 1.000000e-24 : f32
    %4 = vector.broadcast %cst_1 : f32 to vector<8x1xf32>
    %5 = arith.maximumf %3, %4 : vector<8x1xf32>
    %6 = math.rsqrt %5 : vector<8x1xf32>
    %7 = vector.broadcast %6 : vector<8x1xf32> to vector<8x256xf32>
    %8 = arith.mulf %0, %7 : vector<8x256xf32>
    %c0_2 = arith.constant 0 : index
    %c0_3 = arith.constant 0 : index
    %9 = vector.load %arg2[%c0_2, %c0_3] : memref<256x128xf32, #tpu.memory_space<vmem>>, vector<256x128xf32>
    %10 = arith.mulf %9, %9 : vector<256x128xf32>
    %cst_4 = arith.constant dense<0.000000e+00> : vector<128xf32>
    %11 = vector.multi_reduction <add>, %10, %cst_4 [0] : vector<256x128xf32> to vector<128xf32>
    %12 = vector.shape_cast %11 : vector<128xf32> to vector<1x128xf32>
    %cst_5 = arith.constant 1.000000e-24 : f32
    %13 = vector.broadcast %cst_5 : f32 to vector<1x128xf32>
    %14 = arith.maximumf %12, %13 : vector<1x128xf32>
    %15 = math.rsqrt %14 : vector<1x128xf32>
    %16 = vector.broadcast %15 : vector<1x128xf32> to vector<256x128xf32>
    %17 = arith.mulf %9, %16 : vector<256x128xf32>
    %cst_6 = arith.constant dense<0.000000e+00> : vector<8x128xf32>
    %18 = tpu.matmul %8, %17, %cst_6 {dimension_numbers = #tpu.dot_dimension_numbers<[1], [0], [0], [1], [0, 0, 1, 1], [], []>} : vector<8x256xf32>, vector<256x128xf32>, vector<8x128xf32> -> vector<8x128xf32>
    %c0_7 = arith.constant 0 : index
    %c0_8 = arith.constant 0 : index
    %19 = vector.load %arg3[%c0_7, %c0_8] : memref<8x128xf32, #tpu.memory_space<vmem>>, vector<8x128xf32>
    tpu.vector_store %arg3[%c0_7, %c0_8], %18 {strides = array<i32>} : memref<8x128xf32, #tpu.memory_space<vmem>>, vector<8x128xf32>,
    return
  }
  func.func @transform_0(%arg0: i32) -> (i32, i32) {
    %c0_i32 = arith.constant 0 : i32
    %c0_i32_0 = arith.constant 0 : i32
    return %arg0, %c0_i32 : i32, i32
  }
  func.func @transform_1(%arg0: i32) -> (i32, i32) {
    %c0_i32 = arith.constant 0 : i32
    %c0_i32_0 = arith.constant 0 : i32
    %c0_i32_1 = arith.constant 0 : i32
    return %c0_i32, %c0_i32_0 : i32, i32
  }
  func.func @transform_2(%arg0: i32) -> (i32, i32) {
    %c0_i32 = arith.constant 0 : i32
    %c0_i32_0 = arith.constant 0 : i32
    return %arg0, %c0_i32 : i32, i32
  }
}

</mosaic_0001>

<bundles_post_ra>
// kernel: norm_linear_forward.1
= control target key start
LH: loop header
LB: loop body
LE: loop exit
PB: predicated region body
PF: predicated region fallthrough
CT: control target
= control target key end

     0   :  { %7 = vsyncpa [#allocation3], 0  ;;  %s1029_s0 = inlined_call_operand.hbm [shape: f32[16,256], index: 0, kind: input, shape index: {}]   ;;  %s1030_s1 = inlined_call_operand.hbm [shape: f32[256,128], index: 1, kind: input, shape index: {}]   ;;  %s1031_s2 = inlined_call_operand.hbm [shape: f32[16,128], index: 2, kind: output, shape index: {}]  }
   0x1   :  { %9 = vsyncpa [#allocation3 + $0x1], 0 }
   0x2   :  { %10 = vsyncpa [#allocation6], 0 }
   0x3   :  { %11 = vsyncpa [#allocation4], 0 }
   0x4   :  { %13 = vsyncpa [#allocation4 + $0x1], 0  ;;  %s744_s9 = smov 0   ;;  %s746_s10 = smov 0  }
   0x5   :  { %s748_s11 = smov 0   ;;  %s750_s12 = smov 0  }
   0x6 LB: > { %s765_s13 = sadd.s32 4294967295, %s722_s12   ;;  %s486_s14 = sadd.s32 4294967294, %s722_s12   ;;  %s722_s12 = sphi %s750_s12, %s1053_s12   ;;  %s718_s11 = sphi %s748_s11, %s1052_s11   ;;  %s714_s10 = sphi %s746_s10, %s1051_s10   ;;  %s710_s9 = sphi %s744_s9, %s1050_s9  }
   0x7   : > { %p39_p0 = scmp.ne.s32.totalorder %s714_s10, %s710_s9  ;;  %p1032_p1 = scmp.eq.s32.totalorder %s765_s13, 0 }
   0x8   : > { %p90_p3 = scmp.eq.s32.totalorder %s486_s14, 1  ;;  %p487_p5 = scmp.ge.s32.totalorder %s722_s12, 1 }
   0x9   : > { %p774_p4 = por %p1032_p1, %p39_p0  ;;  %p97_p7 = scmp.lt.s32.totalorder %s722_s12, 3 }
   0xa   : > { %p779_p6 = por %p90_p3, %p39_p0  ;;  %s724_s18 = smov [#allocation5]  }
   0xb   : > { %s1036_s15 = scalar_select %p774_p4, 1, 0 }
   0xc   : > { %s1037_s16 = scalar_select %p779_p6, 1, 0 }
   0xd   : > { %p784_p8 = pnand %p487_p5, %p97_p7  ;;  %s109_s19 = sshll.u32 %s724_s18, 4  ;;  %s110_s19 = int_to_ptr.vmem [resolvable:$true] %s109_s19 }
   0xe   : > { %s798_s21 = sadd.s32 1, %s722_s12   ;;  %s26_s22 = sadd.s32 1, %s718_s11 }
   0xf   : > { %s1038_s17 = scalar_select %p784_p8, 1, 0 }
  0x10   : > { %p545_p9 = pneg %p784_p8  ;;  %s23_s23 = ssub.s32 %s722_s12, %s798_s21 }
  0x11   : > { %s611_s24 = scalar_lea.vmem %s110_s19, 4096  ;;  %p619_p5 = scmp.lt.s32.totalorder %s110_s19, %s110_s19 }
  0x12   : > { %p793_p11 = pnand %p545_p9, %p1032_p1  ;;  %p612_p13 = scmp.ne.s32.totalorder %s110_s19, %s611_s24 }
  0x13   : > { %p620_p7 = scmp.lt.s32.totalorder %s611_s24, %s611_s24 }
  0x14   : > { %p602_p12 = pneg %p793_p11 }
  0x15   : > { %p621_p10 = por %p620_p7, %p619_p5 }
  0x16   : > { %p614_p0 = pnand %p612_p13, %p602_p12 }
  0x18   : > { %p615_p3 = pneg %p614_p0 }
  0x1a   : > { %p622_p2 = pnand %p621_p10, %p615_p3 }
  0x1c   : > { %625 = shalt.err (!%p622_p2)
}
  0x1d   : > { %s725_s25 = smov 128   ;;  %s726_s26 = smov 8  }
  0x1e   : > { %548 = dma.hbm_to_vmem [thread:$0]  (!%p793_p11), %s1030_s1, 4096, %s110_s19, [#allocation6], %s725_s25, %s725_s25, %s726_s26  }
  0x1f   : > { %p24_p9 = scmp.eq.s32.totalorder %s23_s23, 0  ;;  %p33_p12 = scmp.ne.s32.totalorder %s718_s11, %s714_s10 }
  0x20   : > { %p34_p10 = scmp.eq.s32.totalorder %s722_s12, 0  ;;  %p558_p2 = scmp.lt.s32.totalorder %s722_s12, 2 }
  0x21   : > { %s815_s29 = scalar_select %p24_p9, %s718_s11, %s26_s22  }
  0x22   : > { %p35_p13 = por %p34_p10, %p33_p12  ;;  %p1040_p0 = scmp.eq.s32.totalorder %s765_s13, 1 }
  0x23   : > { %s123_s3 = sand.u32 1, %s718_s11   ;;  %s501_s4 = sshll.u32 %s722_s12, 8 }
  0x24   : > { %p819_p3 = por %p1040_p0, %p33_p12  ;;  %s490_s5 = sshll.u32 %s123_s3, 4 }
  0x25   : > { %s828_s8 = scalar_lea.hbm %s1029_s0, %s501_s4  ;;  %s127_s14 = scalar_lea.vmem [#allocation2], %s490_s5 }
  0x26   : > { %s1041_s30 = scalar_select %p819_p3, 1, 0 }
  0x27   : > { %s135_s18 = sshll.u32 %s127_s14, 4  ;;  %p830_p11 = pnand %p558_p2, %p35_p13  ;;  %s136_s18 = int_to_ptr.vmem [resolvable:$true] %s135_s18 }
  0x28   : > { %s124_s20 = scalar_lea.sflag [#allocation3], %s123_s3  ;;  %s626_s22 = scalar_lea.hbm %s828_s8, 256 }
  0x29   : > { %p627_p5 = scmp.ne.s32.totalorder %s828_s8, %s626_s22  ;;  %p628_p7 = pneg %p830_p11 }
  0x2a   : > { %s631_s25 = scalar_lea.hbm %s1029_s0, 512  ;;  %p632_p10 = scmp.lt.s32.totalorder %s828_s8, %s1029_s0 }
  0x2b   : > { %p629_p9 = pnand %p628_p7, %p627_p5  ;;  %p633_p2 = scmp.lt.s32.totalorder %s631_s25, %s626_s22 }
  0x2d   : > { %p630_p12 = pneg %p629_p9  ;;  %p634_p13 = por %p633_p2, %p632_p10 }
  0x2f   : > { %p635_p0 = pnand %p634_p13, %p630_p12 }
  0x31   : > { %638 = shalt.err (!%p635_p0)
}
  0x32   : > { %s639_s28 = scalar_lea.vmem %s136_s18, 256  ;;  %s727_s3 = smov [#allocation2]  }
  0x33   : > { %p640_p1 = scmp.ne.s32.totalorder %s136_s18, %s639_s28  ;;  %s644_s4 = sshll.u32 %s727_s3, 4  ;;  %s645_s4 = int_to_ptr.vmem [resolvable:$false] %s644_s4 }
  0x34   : > { %s646_s5 = scalar_lea.vmem %s645_s4, 512  ;;  %p647_p5 = scmp.lt.s32.totalorder %s136_s18, %s645_s4 }
  0x35   : > { %p642_p6 = pnand %p640_p1, %p628_p7  ;;  %p648_p9 = scmp.lt.s32.totalorder %s646_s5, %s639_s28 }
  0x37   : > { %p643_p3 = pneg %p642_p6  ;;  %p649_p4 = por %p648_p9, %p647_p5 }
  0x39   : > { %p650_p8 = pnand %p649_p4, %p643_p3 }
  0x3b   : > { %653 = shalt.err (!%p650_p8)
}
  0x3c   : > { %552 = dma.hbm_to_vmem [thread:$0]  (!%p830_p11), %s828_s8, 256, %s136_s18, %s124_s20  }
  0x3d   : > { %p1043_p12 = scmp.ne.s32.totalorder %s1038_s17, 0 }
  0x3e   : > { %s851_s6 = sand.u32 (!%p1043_p12), 1, %s714_s10   ;;  %p1044_p1 = scmp.ne.s32.totalorder (!%p1043_p12), %s1036_s15, 0 }
  0x3f   : > { %144 = sbr.rel (%p1043_p12) target bundleno = 444 (0x1bc), region = 28  ;;  %s494_s7 = sshll.u32 (!%p1043_p12), %s851_s6, 4 }
  0x40   : > { %s147_s14 = scalar_lea.sflag (!%p1043_p12), [#allocation3], %s851_s6  ;;  %s150_s22 = scalar_lea.vmem (!%p1043_p12), [#allocation2], %s494_s7 }
  0x44   : > { %697 = dma.done.wait (%p1044_p1), %s147_s14, 256  }
  0x45   : > { %699 = vsyncadd (%p1044_p1), %s147_s14, 4294967040  ;;  %p1045_p4 = scmp.eq.s32.totalorder %s765_s13, 0 }
  0x47   : > { %701 = dma.done.wait (%p1045_p4), [#allocation6], 4096   ;;  %p1046_p6 = pmov %p1045_p4 }
  0x48   : > { %v863_v0 = vld [vmem:[%s150_s22] sm:$0xff]  ;;  %v865_v1 = vld [vmem:[%s150_s22 + $0x8] sm:$0xff]  ;;  %s496_s15 = sshll.u32 %s851_s6, 3  ;;  %s498_s17 = sshll.u32 %s765_s13, 7 }
  0x49   : > { %703 = vsyncadd (%p1046_p6), [#allocation6], 4294963200  ;;  %v867_v2 = vld [vmem:[#allocation5] sm:$0xff]  ;;  %v177_v3 = vmul.f32 %v863_v0, %v863_v0  ;;  %v178_v4 = vmul.f32 %v865_v1, %v865_v1  ;;  %v873_v5 = vld [vmem:[#allocation5 + $0x8] sm:$0xff]  ;;  %s174_s8 = scalar_lea.vmem [#allocation7], %s496_s15  ;;  %s404_s23 = scalar_lea.hbm %s1031_s2, %s498_s17 }
  0x4a   : > { %v875_v6 = vld [vmem:[#allocation5 + $0x10] sm:$0xff]  ;;  %v877_v7 = vld [vmem:[#allocation5 + $0x18] sm:$0xff]  ;;  %v218_v8 = vmul.f32 %v867_v2, %v867_v2  ;;  %v219_v9 = vmul.f32 %v873_v5, %v873_v5  ;;  %v885_v12 = vld [vmem:[#allocation5 + $0x20] sm:$0xff]  ;;  %s406_s18 = sshll.u32 %s174_s8, 4  ;;  %s393_s24 = scalar_lea.sflag [#allocation4], %s851_s6  ;;  %s407_s18 = int_to_ptr.vmem [resolvable:$true] %s406_s18 }
  0x4b   : > { %v220_v10 = vmul.f32 %v875_v6, %v875_v6  ;;  %v179_v11 = vadd.f32 %v178_v4, %v177_v3  ;;  %v221_v13 = vmul.f32 %v877_v7, %v877_v7  ;;  %v889_v15 = vld [vmem:[#allocation5 + $0x28] sm:$0xff]  ;;  %v222_v16 = vmul.f32 %v885_v12, %v885_v12  ;;  %v893_v18 = vld [vmem:[#allocation5 + $0x30] sm:$0xff]  ;;  %v897_v21 = vld [vmem:[#allocation5 + $0x38] sm:$0xff]  ;;  %s654_s25 = scalar_lea.vmem %s407_s18, 128  ;;  %p1047_p3 = scmp.ne.s32.totalorder %s1041_s30, 0 }
  0x4c   : > { %v250_v14 = vadd.f32 %v219_v9, %v218_v8  ;;  %v223_v19 = vmul.f32 %v889_v15, %v889_v15  ;;  %v224_v22 = vmul.f32 %v893_v18, %v893_v18  ;;  %v901_v24 = vld [vmem:[#allocation5 + $0x40] sm:$0xff]  ;;  %v225_v25 = vmul.f32 %v897_v21, %v897_v21  ;;  %v905_v27 = vld [vmem:[#allocation5 + $0x48] sm:$0xff]  ;;  %v909_v30 = vld [vmem:[#allocation5 + $0x50] sm:$0xff]  ;;  %p655_p8 = scmp.ne.s32.totalorder %s407_s18, %s654_s25  ;;  %s728_s26 = smov [#allocation7]  }
  0x4d   : > { %180 = vadd.xlane.f32.xlu0 %v179_v11  ;;  %v226_v28 = vmul.f32 %v901_v24, %v901_v24  ;;  %v227_v31 = vmul.f32 %v905_v27, %v905_v27  ;;  %v913_v33 = vld [vmem:[#allocation5 + $0x58] sm:$0xff]  ;;  %v228_v34 = vmul.f32 %v909_v30, %v909_v30  ;;  %v917_v36 = vld [vmem:[#allocation5 + $0x60] sm:$0xff]  ;;  %v921_v39 = vld [vmem:[#allocation5 + $0x68] sm:$0xff]  ;;  %s658_s27 = sshll.u32 %s728_s26, 4  ;;  %s659_s27 = int_to_ptr.vmem [resolvable:$false] %s658_s27 }
  0x4e   : > { %v251_v17 = vadd.f32 %v250_v14, %v220_v10  ;;  %v229_v37 = vmul.f32 %v913_v33, %v913_v33  ;;  %v230_v40 = vmul.f32 %v917_v36, %v917_v36  ;;  %v925_v42 = vld [vmem:[#allocation5 + $0x70] sm:$0xff]  ;;  %v231_v43 = vmul.f32 %v921_v39, %v921_v39  ;;  %v929_v45 = vld [vmem:[#allocation5 + $0x78] sm:$0xff]  ;;  %v933_v48 = vld [vmem:[#allocation5 + $0x80] sm:$0xff]  ;;  %p656_p11 = pnand %p655_p8, %p1047_p3  ;;  %s660_s13 = scalar_lea.vmem %s659_s27, 256 }
  0x4f   : > { %v232_v46 = vmul.f32 %v925_v42, %v925_v42  ;;  %v233_v49 = vmul.f32 %v929_v45, %v929_v45  ;;  %v937_v51 = vld [vmem:[#allocation5 + $0x88] sm:$0xff]  ;;  %v234_v52 = vmul.f32 %v933_v48, %v933_v48  ;;  %v941_v54 = vld [vmem:[#allocation5 + $0x90] sm:$0xff]  ;;  %v945_v57 = vld [vmem:[#allocation5 + $0x98] sm:$0xff]  ;;  %p661_p10 = scmp.lt.s32.totalorder %s407_s18, %s659_s27  ;;  %p662_p2 = scmp.lt.s32.totalorder %s660_s13, %s654_s25 }
  0x50   : > { %v252_v20 = vadd.f32 %v251_v17, %v221_v13  ;;  %v235_v55 = vmul.f32 %v937_v51, %v937_v51  ;;  %v236_v58 = vmul.f32 %v941_v54, %v941_v54  ;;  %v949_v60 = vld [vmem:[#allocation5 + $0xa0] sm:$0xff]  ;;  %v237_v61 = vmul.f32 %v945_v57, %v945_v57  ;;  %v953_v63 = vld [vmem:[#allocation5 + $0xa8] sm:$0xff]  ;;  %v957_v8 = vld [vmem:[#allocation5 + $0xb0] sm:$0xff]  ;;  %p657_p7 = pneg %p656_p11 }
  0x51   : > { %v238_v3 = vmul.f32 %v949_v60, %v949_v60  ;;  %v239_v9 = vmul.f32 %v953_v63, %v953_v63  ;;  %v961_v11 = vld [vmem:[#allocation5 + $0xb8] sm:$0xff]  ;;  %v240_v13 = vmul.f32 %v957_v8, %v957_v8  ;;  %p663_p13 = por %p662_p2, %p661_p10 }
  0x52   : > { %v253_v23 = vadd.f32 %v252_v20, %v222_v16  ;;  %v210_v16 = vld [vmem:[#allocation5 + $0xc0] sm:$0xff]  ;;  %v241_v17 = vmul.f32 %v961_v11, %v961_v11  ;;  %v211_v20 = vld [vmem:[#allocation5 + $0xc8] sm:$0xff] }
  0x53   : > { %p664_p0 = pnand %p663_p13, %p657_p7 }
  0x54   : > { %v254_v26 = vadd.f32 %v253_v23, %v223_v19 }
  0x56   : > { %v255_v29 = vadd.f32 %v254_v26, %v224_v22  ;;  %v242_v22 = vmul.f32 %v210_v16, %v210_v16  ;;  %v243_v26 = vmul.f32 %v211_v20, %v211_v20 }
  0x58   : > { %v256_v32 = vadd.f32 %v255_v29, %v225_v25  ;;  %v212_v25 = vld [vmem:[#allocation5 + $0xd0] sm:$0xff]  ;;  %v213_v29 = vld [vmem:[#allocation5 + $0xd8] sm:$0xff] }
  0x5a   : > { %v257_v35 = vadd.f32 %v256_v32, %v226_v28 }
  0x5c   : > { %v258_v38 = vadd.f32 %v257_v35, %v227_v31  ;;  %v244_v31 = vmul.f32 %v212_v25, %v212_v25  ;;  %v245_v35 = vmul.f32 %v213_v29, %v213_v29 }
  0x5e   : > { %v259_v41 = vadd.f32 %v258_v38, %v228_v34  ;;  %v214_v34 = vld [vmem:[#allocation5 + $0xe0] sm:$0xff]  ;;  %v215_v38 = vld [vmem:[#allocation5 + $0xe8] sm:$0xff] }
  0x60   : > { %v260_v44 = vadd.f32 %v259_v41, %v229_v37 }
  0x62   : > { %v261_v47 = vadd.f32 %v260_v44, %v230_v40  ;;  %v246_v40 = vmul.f32 %v214_v34, %v214_v34  ;;  %v247_v44 = vmul.f32 %v215_v38, %v215_v38 }
  0x64   : > { %v262_v50 = vadd.f32 %v261_v47, %v231_v43  ;;  %v216_v43 = vld [vmem:[#allocation5 + $0xf0] sm:$0xff]  ;;  %v217_v47 = vld [vmem:[#allocation5 + $0xf8] sm:$0xff] }
  0x66   : > { %v263_v53 = vadd.f32 %v262_v50, %v232_v46 }
  0x68   : > { %v264_v56 = vadd.f32 %v263_v53, %v233_v49  ;;  %v248_v49 = vmul.f32 %v216_v43, %v216_v43 }
  0x6a   : > { %v265_v59 = vadd.f32 %v264_v56, %v234_v52  ;;  %v249_v52 = vmul.f32 %v217_v47, %v217_v47 }
  0x6c   : > { %v266_v62 = vadd.f32 %v265_v59, %v235_v55 }
  0x6e   : > { %v267_v4 = vadd.f32 %v266_v62, %v236_v58 }
  0x70   : > { %v268_v10 = vadd.f32 %v267_v4, %v237_v61 }
  0x72   : > { %v269_v14 = vadd.f32 %v268_v10, %v238_v3 }
  0x74   : > { %v270_v19 = vadd.f32 %v269_v14, %v239_v9 }
  0x76   : > { %v271_v23 = vadd.f32 %v270_v19, %v240_v13 }
  0x78   : > { %v272_v28 = vadd.f32 %v271_v23, %v241_v17 }
  0x7a   : > { %v273_v32 = vadd.f32 %v272_v28, %v242_v22 }
  0x7c   : > { %v274_v37 = vadd.f32 %v273_v32, %v243_v26 }
  0x7e   : > { %v275_v41 = vadd.f32 %v274_v37, %v244_v31 }
  0x80   : > { %v276_v46 = vadd.f32 %v275_v41, %v245_v35 }
  0x82   : > { %v277_v50 = vadd.f32 %v276_v46, %v246_v40 }
  0x84   : > { %v278_v53 = vadd.f32 %v277_v50, %v247_v44 }
  0x86   : > { %v279_v55 = vadd.f32 %v278_v53, %v248_v49 }
  0x88   : > { %v280_v56 = vadd.f32 %v279_v55, %v249_v52 }
  0x8a   : > { %v281_v58 = vrot.slane %v280_v56, 4 }
  0x8c   : > { %v282_v59 = vadd.f32 %v281_v58, %v280_v56 }
  0x8e   : > { %v283_v61 = vrot.slane %v282_v59, 2 }
  0x90   : > { %v284_v62 = vadd.f32 %v283_v61, %v282_v59 }
  0x92   : > { %v285_v3 = vrot.slane %v284_v62, 1 }
  0x94   : > { %v286_v4 = vadd.f32 %v285_v3, %v284_v62 }
  0x96   : > { %v287_v9 = vmax.f32 %v286_v4, 1e-24 }
  0x98   : > { %596 = vrsqrt.f32 %v287_v9 }
  0xa5   : > { %v597_v10 = vpop.eup %596 }
  0xa6   : > { %v320_v13 = vmul.f32 %v597_v10, %v217_v47  ;;  %v304_v14 = vmul.f32 %v597_v10, %v929_v45  ;;  %v319_v17 = vmul.f32 %v597_v10, %v216_v43  ;;  %v303_v19 = vmul.f32 %v597_v10, %v925_v42 }
  0xa7   : > { %v318_v22 = vmul.f32 %v597_v10, %v215_v38  ;;  %v302_v23 = vmul.f32 %v597_v10, %v921_v39  ;;  %v317_v26 = vmul.f32 %v597_v10, %v214_v34  ;;  %v301_v28 = vmul.f32 %v597_v10, %v917_v36 }
  0xa8   : > { %502 = vmatprep.subr.mxu0 %v320_v13  ;;  %v316_v31 = vmul.f32 %v597_v10, %v213_v29  ;;  %v300_v32 = vmul.f32 %v597_v10, %v913_v33  ;;  %v315_v45 = vmul.f32 %v597_v10, %v212_v25  ;;  %v299_v42 = vmul.f32 %v597_v10, %v909_v30 }
  0xa9   : > { %503 = vmatpush3.msra.mxu0 %v304_v14  ;;  %v314_v35 = vmul.f32 %v597_v10, %v211_v20  ;;  %v298_v39 = vmul.f32 %v597_v10, %v905_v27  ;;  %v313_v34 = vmul.f32 %v597_v10, %v210_v16  ;;  %v297_v36 = vmul.f32 %v597_v10, %v901_v24 }
  0xaa   : > { %504 = vmatprep.subr.mxu0 %v319_v17  ;;  %v312_v29 = vmul.f32 %v597_v10, %v961_v11  ;;  %v296_v33 = vmul.f32 %v597_v10, %v897_v21  ;;  %v311_v25 = vmul.f32 %v597_v10, %v957_v8  ;;  %v295_v30 = vmul.f32 %v597_v10, %v893_v18 }
  0xab   : > { %505 = vmatpush3.msra.mxu0 %v303_v19  ;;  %v310_v27 = vmul.f32 %v597_v10, %v953_v63  ;;  %v294_v16 = vmul.f32 %v597_v10, %v889_v15  ;;  %v309_v24 = vmul.f32 %v597_v10, %v949_v60  ;;  %v293_v11 = vmul.f32 %v597_v10, %v885_v12 }
  0xac   : > { %506 = vmatprep.subr.mxu0 %v318_v22  ;;  %v308_v21 = vmul.f32 %v597_v10, %v945_v57  ;;  %v292_v8 = vmul.f32 %v597_v10, %v877_v7  ;;  %v307_v18 = vmul.f32 %v597_v10, %v941_v54  ;;  %v291_v63 = vmul.f32 %v597_v10, %v875_v6 }
  0xad   : > { %507 = vmatpush3.msra.mxu0 %v302_v23  ;;  %v306_v15 = vmul.f32 %v597_v10, %v937_v51  ;;  %v290_v60 = vmul.f32 %v597_v10, %v873_v5  ;;  %v305_v12 = vmul.f32 %v597_v10, %v933_v48  ;;  %v289_v7 = vmul.f32 %v597_v10, %v867_v2 }
  0xae   : > { %508 = vmatprep.subr.mxu0 %v317_v26 }
  0xaf   : > { %509 = vmatpush3.msra.mxu0 %v301_v28 }
  0xb0   : > { %510 = vmatprep.subr.mxu0 %v316_v31 }
  0xb1   : > { %511 = vmatpush3.msra.mxu0 %v300_v32 }
  0xb2   : > { %512 = vmatprep.subr.mxu0 %v315_v45 }
  0xb3   : > { %513 = vmatpush3.msra.mxu0 %v299_v42 }
  0xb4   : > { %514 = vmatprep.subr.mxu0 %v314_v35 }
  0xb5   : > { %515 = vmatpush3.msra.mxu0 %v298_v39 }
  0xb6   : > { %516 = vmatprep.subr.mxu0 %v313_v34 }
  0xb7   : > { %517 = vmatpush3.msra.mxu0 %v297_v36 }
  0xb8   : > { %518 = vmatprep.subr.mxu0 %v312_v29 }
  0xb9   : > { %519 = vmatpush3.msra.mxu0 %v296_v33 }
  0xba   : > { %520 = vmatprep.subr.mxu0 %v311_v25 }
  0xbb   : > { %521 = vmatpush3.msra.mxu0 %v295_v30 }
  0xbc   : > { %522 = vmatprep.subr.mxu0 %v310_v27 }
  0xbd   : > { %523 = vmatpush3.msra.mxu0 %v294_v16 }
  0xbe   : > { %524 = vmatprep.subr.mxu0 %v309_v24 }
  0xbf   : > { %525 = vmatpush3.msra.mxu0 %v293_v11 }
  0xc0   : > { %526 = vmatprep.subr.mxu0 %v308_v21 }
  0xc1   : > { %527 = vmatpush3.msra.mxu0 %v292_v8 }
  0xc2   : > { %528 = vmatprep.subr.mxu0 %v307_v18 }
  0xc3   : > { %529 = vmatpush3.msra.mxu0 %v291_v63 }
  0xc4   : > { %530 = vmatprep.subr.mxu0 %v306_v15 }
  0xc5   : > { %531 = vmatpush3.msra.mxu0 %v290_v60 }
  0xc6   : > { %532 = vmatprep.subr.mxu0 %v305_v12 }
  0xc7   : > { %533 = vmatpush3.msra.mxu0 %v289_v7 }
  0xd6   : > { %v181_v54 = vpop.xlane.xlu0 %180 }
  0xd7   : > { %v182_v6 = vmax.f32 %v181_v54, 1e-24 }
  0xd9   : > { %598 = vrsqrt.f32 %v182_v6 }
  0xe6   : > { %v599_v51 = vpop.eup %598 }
  0xe7   : > { %v185_v57 = vmul.f32 %v599_v51, %v865_v1  ;;  %v184_v5 = vmul.f32 %v599_v51, %v863_v0 }
  0xe9   : > { %385 = vmatprep.mubr.f32.mxu0 %v185_v57 }
  0xea   : > { %386 = vmatmul.mubr.f32.vlgmr.msra.gmra.mxu0 %v184_v5 }
 0x1aa   : > { %v534_v48 = vpop.f32.mrf.mxu0 }
 0x1ac   : > { %v535_v2 = vpop.f32.mrf.mxu0 }
 0x1ad   : > { %v536_v20 = vadd.f32 %v535_v2, %v534_v48 }
 0x1af   : > { %391 = vst [vmem:[%s174_s8] sm:$0xff] %v536_v20 }
 0x1b0   : > { %667 = shalt.err (!%p664_p0)
}
 0x1b1   : > { %s668_s28 = scalar_lea.hbm %s404_s23, 128  ;;  %s672_s5 = scalar_lea.hbm %s1031_s2, 256 }
 0x1b2   : > { %p669_p5 = scmp.ne.s32.totalorder %s404_s23, %s668_s28  ;;  %p673_p1 = scmp.lt.s32.totalorder %s404_s23, %s1031_s2 }
 0x1b3   : > { %p674_p4 = scmp.lt.s32.totalorder %s672_s5, %s668_s28 }
 0x1b4   : > { %p670_p9 = pnand %p669_p5, %p1047_p3 }
 0x1b5   : > { %p675_p6 = por %p674_p4, %p673_p1 }
 0x1b6   : > { %p671_p12 = pneg %p670_p9 }
 0x1b8   : > { %p676_p8 = pnand %p675_p6, %p671_p12 }
 0x1ba   : > { %679 = shalt.err (!%p676_p8)
}
 0x1bb   : > { %543 = dma.vmem_to_hbm [thread:$0]  (%p1047_p3), %s407_s18, 128, %s404_s23, %s393_s24  }
 0x1bc PF: > { %s418_s14 = sand.u32 1, %s710_s9   ;;  %p1048_p11 = scmp.ne.s32.totalorder %s1037_s16, 0 }
 0x1bd   : > { %p1049_p7 = scmp.ge.s32.totalorder %s722_s12, 2  ;;  %s419_s22 = scalar_lea.sflag [#allocation4], %s418_s14 }
 0x1bf   : > { %p554_p10 = pnand %p1049_p7, %p1048_p11 }
 0x1c1   : > { %p555_p2 = pneg %p554_p10 }
 0x1c3   : > { %705 = dma.done.wait (%p555_p2), %s419_s22, 128  }
 0x1c4   : > { %707 = vsyncadd (%p555_p2), %s419_s22, 4294967168  ;;  %p16_p13 = scmp.ge.s32.totalorder %s798_s21, 4   ;;  %s1050_s9 = smov %s714_s10 }
 0x1c5   : > { %s1051_s10 = smov %s718_s11  ;;  %s1052_s11 = smov %s815_s29 }
 0x1c6   : > { %s1053_s12 = smov %s798_s21  ;;  %18 = sbr.rel (!%p16_p13) target bundleno = 6 (0x6), region = 77 }
 0x1cb   :  { %424 = vsyncpa [#allocation3], 1 }
 0x1cc   :  { %426 = vsyncpa [#allocation3 + $0x1], 1 }
 0x1cd   :  { %427 = vsyncpa [#allocation6], 1 }
 0x1ce   :  { %428 = vsyncpa [#allocation4], 1 }
 0x1cf   :  { %430 = vsyncpa [#allocation4 + $0x1], 1 }

</bundles_post_ra>
